<compile_context>
chip_gen: v7x
topology: tpu7x:2x2x1
jax: 0.10.0
libtpu: 0.0.40
codegen_flags: <defaults>
</compile_context>

<pallas_src>
import jax
import jax.numpy as jnp
from jax import lax
from jax.experimental import pallas as pl
from jax.experimental.pallas import tpu as pltpu


_H1, _H2, _H3 = 128, 64, 32
_K_TILE = 512                              # layer-1 K tile for gene-scale D
_MAX_BATCH_TILE = 8192
_FALLBACK_VMEM_BYTES = 64 * 1024 * 1024    # v7x per-core physical VMEM


def _cdiv(a, b):
    return -(-a // b)


def _round_up(n, m):
    return _cdiv(n, m) * m


def _vmem_capacity_bytes():
    try:
        cap = getattr(pltpu.get_tpu_info(), "vmem_capacity_bytes", None)
        if cap:
            return max(int(cap), 32 * 1024 * 1024)
    except Exception:
        pass
    return _FALLBACK_VMEM_BYTES


def _plan_tiles(batch, d, x_itemsize):
    """Pick (batch_tile, num_b, k_tile, num_k, vmem_limit) so the double-buffered
    pipeline fits a generation-aware VMEM budget."""
    cap = _vmem_capacity_bytes()
    budget = (cap * 3) // 5                      # ~38 MiB (v7x) / ~77 MiB (v5e/v6e)
    vmem_limit = max(32 << 20, min((cap * 3) // 4, cap - (8 << 20)))
    b8 = _round_up(batch, 8)

    small_fixed = 2 * 4 * (_H1 * _H2 + _H2 * _H3 + _H1 + _H2 + _H3 + _H3)

    def batch_cap(kt):
        fixed = small_fixed + 2 * kt * _H1 * 2          # double-buffered bf16 w1 tile
        per_row = (2 * x_itemsize * kt                  # double-buffered x tile
                   + 2 * kt                             # in-register bf16 copy of x
                   + 4 * _H1                            # f32 layer-1 accumulator
                   + 4 * (_H1 + _H2 + _H3)              # live activations
                   + 2 * 4)                             # double-buffered f32 out row
        return max(0, (budget - fixed) // per_row)

    # Single K step (k_tile == D: no mask, no w1 pad) when it still allows a
    # healthy batch tile; otherwise K-tile layer 1 (gene-scale D).
    k_tile = d if batch_cap(d) >= min(256, b8) else _K_TILE
    num_k = _cdiv(d, k_tile)

    cap_rows = min(_MAX_BATCH_TILE, batch_cap(k_tile))
    if b8 <= cap_rows:
        if b8 >= 256:
            # >= 2 tiles so the "parallel" batch axis shards across v7x's two TCs.
            batch_tile = _round_up(_cdiv(b8, 2), 128)
        else:
            batch_tile = b8
    else:
        batch_tile = max(128, (cap_rows // 128) * 128)
    num_b = _cdiv(b8, batch_tile)
    return batch_tile, num_b, k_tile, num_k, vmem_limit


def _make_kernel(num_k, k_tile, d_rem):
    """Build the fused-MLP kernel. num_k/k_tile/d_rem are static Python ints."""

    def finalize(acc, b1_ref, w2_ref, b2_ref, w3_ref, b3_ref, w4t_ref, b4_ref, o_ref):
        h = jnp.maximum(acc + b1_ref[...], 0.0)
        # TODO(synk): nn.Dropout(0.5) is identity in eval mode; training-mode
        # dropout (PRNG mask + 2x rescale) is intentionally not applied here.
        h = jnp.dot(h.astype(jnp.bfloat16), w2_ref[...],
                    preferred_element_type=jnp.float32) + b2_ref[...]
        h = jnp.maximum(h, 0.0)
        h = jnp.dot(h.astype(jnp.bfloat16), w3_ref[...],
                    preferred_element_type=jnp.float32) + b3_ref[...]
        h = jnp.maximum(h, 0.0)
        # Output layer: contract w4^T (1, 32) against h's feature axis -> a
        # lane-dense (1, batch_tile) row (no N=1 matmul, no sliver store).
        z = lax.dot_general(w4t_ref[...], h, (((1,), (1,)), ((), ())),
                            preferred_element_type=jnp.float32)
        o_ref[...] = jax.nn.sigmoid(z + b4_ref[0]).astype(o_ref.dtype)

    if num_k == 1:
        def kernel(x_ref, w1_ref, b1_ref, w2_ref, b2_ref, w3_ref, b3_ref,
                   w4t_ref, b4_ref, o_ref):
            # bf16 cast happens in-register; x is DMA'd in the caller's dtype.
            acc = jnp.dot(x_ref[...].astype(jnp.bfloat16), w1_ref[...],
                          preferred_element_type=jnp.float32)
            finalize(acc, b1_ref, w2_ref, b2_ref, w3_ref, b3_ref,
                     w4t_ref, b4_ref, o_ref)
        return kernel

    def kernel(x_ref, w1_ref, b1_ref, w2_ref, b2_ref, w3_ref, b3_ref,
               w4t_ref, b4_ref, o_ref, acc_ref):
        k = pl.program_id(1)

        @pl.when(k == 0)
        def _():
            acc_ref[...] = jnp.zeros_like(acc_ref)

        x_t = x_ref[...]
        if d_rem:
            # Zero the K fringe of the last tile so stale VMEM (times the
            # zero-padded w1 rows) cannot contaminate the accumulation.
            limit = jnp.where(k == num_k - 1, d_rem, k_tile)
            col = lax.broadcasted_iota(jnp.int32, x_t.shape, 1)
            x_t = jnp.where(col < limit, x_t, 0.0)

        acc_ref[...] += jnp.dot(x_t.astype(jnp.bfloat16), w1_ref[...],
                                preferred_element_type=jnp.float32)

        @pl.when(k == num_k - 1)
        def _():
            finalize(acc_ref[...], b1_ref, w2_ref, b2_ref, w3_ref, b3_ref,
                     w4t_ref, b4_ref, o_ref)

    return kernel


def gene_expression_nn(x, params, *, batch_tile=None, k_tile=None):
    """Fused forward pass (eval mode).

    x: (B, D) float array (f32 or bf16). params: w1 (D,128), b1 (1,128),
    w2 (128,64), b2 (1,64), w3 (64,32), b3 (1,32), w4 (32,1), b4 (1,1).
    Returns (B, 1) float32.
    """
    batch, d = x.shape
    itemsize = jnp.dtype(x.dtype).itemsize
    auto_bt, auto_nb, auto_kt, auto_nk, vmem_limit = _plan_tiles(batch, d, itemsize)

    if k_tile is None:
        k_tile, num_k = auto_kt, auto_nk
    else:
        k_tile = min(int(k_tile), d)
        num_k = _cdiv(d, k_tile)
    if batch_tile is None:
        batch_tile, num_b = auto_bt, auto_nb
    else:
        batch_tile = _round_up(int(batch_tile), 8)
        num_b = _cdiv(_round_up(batch, 8), batch_tile)
    if num_b > 1 and batch_tile % 128:
        raise ValueError("batch_tile must be a multiple of 128 when the batch "
                         "grid axis has more than one step")
    if num_k > 1 and k_tile % 128:
        raise ValueError("k_tile must be a multiple of 128 when K-tiling layer 1")

    # x stays in the caller's dtype; pad rows only when truly ragged (sublane
    # rule). Garbage fringe rows only feed output columns that are sliced away.
    if batch % 8:
        x = jnp.pad(x, ((0, _round_up(batch, 8) - batch), (0, 0)))

    # Weight prep (bf16 MXU operands; static zero-pad of w1's K fringe).
    w1 = params["w1"].astype(jnp.bfloat16)                      # (D, 128)
    d_pad = k_tile * num_k
    if d_pad != d:
        w1 = jnp.pad(w1, ((0, d_pad - d), (0, 0)))
    b1 = params["b1"].astype(jnp.float32).reshape(1, _H1)
    w2 = params["w2"].astype(jnp.bfloat16)                       # (128, 64)
    b2 = params["b2"].astype(jnp.float32).reshape(1, _H2)
    w3 = params["w3"].astype(jnp.bfloat16)                       # (64, 32)
    b3 = params["b3"].astype(jnp.float32).reshape(1, _H3)
    w4t = params["w4"].astype(jnp.float32).reshape(1, _H3)       # (1, 32) == w4.T
    b4 = params["b4"].astype(jnp.float32).reshape(-1)            # (1,) scalar -> SMEM

    b_out = batch_tile * num_b
    d_rem = d % k_tile if num_k > 1 else 0
    kernel = _make_kernel(num_k, k_tile, d_rem)

    def invariant(arr):
        # Grid-invariant operands (tiny; w1 is handled by the K axis).
        # TODO(synk): pipeline_mode=pl.Buffered(1) would single-buffer these on
        # v7x; left at the default double-buffering for portability.
        return pl.BlockSpec(arr.shape, lambda i, k: (0, 0))

    flops = 2 * batch * (d * _H1 + _H1 * _H2 + _H2 * _H3 + _H3)
    weight_bytes = (w1.size * 2 + w2.size * 2 + w3.size * 2 +
                    (b1.size + b2.size + b3.size + w4t.size + b4.size) * 4)
    bytes_accessed = batch * d * itemsize + num_b * weight_bytes + b_out * 4

    scratch_shapes = []
    if num_k > 1:
        scratch_shapes.append(pltpu.VMEM((batch_tile, _H1), jnp.float32))

    out = pl.pallas_call(
        kernel,
        out_shape=jax.ShapeDtypeStruct((1, b_out), jnp.float32),
        grid_spec=pltpu.PrefetchScalarGridSpec(
            num_scalar_prefetch=0,
            grid=(num_b, num_k),                                 # reduction axis last
            in_specs=[
                pl.BlockSpec((batch_tile, k_tile), lambda i, k: (i, k)),   # x tile
                pl.BlockSpec((k_tile, _H1), lambda i, k: (k, 0)),          # w1 K tile
                invariant(b1),
                invariant(w2), invariant(b2),
                invariant(w3), invariant(b3),
                invariant(w4t),
                pl.BlockSpec(memory_space=pltpu.MemorySpace.SMEM),         # b4 scalar
            ],
            out_specs=pl.BlockSpec((1, batch_tile), lambda i, k: (0, i)),  # lane-dense
            scratch_shapes=scratch_shapes,
        ),
        compiler_params=pltpu.CompilerParams(
            dimension_semantics=("parallel", "arbitrary"),
            vmem_limit_bytes=int(vmem_limit),
        ),
        cost_estimate=pl.CostEstimate(
            flops=int(flops),
            transcendentals=int(batch),
            bytes_accessed=int(bytes_accessed)),
    )(x, w1, b1, w2, b2, w3, b3, w4t, b4)

    return out[0, :batch].reshape(batch, 1)


def init_params(key, input_size):
    """Deterministic init mimicking nn.Linear's U(-1/sqrt(fan_in), 1/sqrt(fan_in))."""
    dims = [(input_size, _H1), (_H1, _H2), (_H2, _H3), (_H3, 1)]
    params = {}
    keys = jax.random.split(key, 2 * len(dims))
    for idx, (fan_in, fan_out) in enumerate(dims):
        bound = 1.0 / jnp.sqrt(jnp.float32(fan_in))
        params[f"w{idx + 1}"] = jax.random.uniform(
            keys[2 * idx], (fan_in, fan_out), minval=-bound, maxval=bound,
            dtype=jnp.float32)
        params[f"b{idx + 1}"] = jax.random.uniform(
            keys[2 * idx + 1], (1, fan_out), minval=-bound, maxval=bound,
            dtype=jnp.float32)
    return params


def _bf16_round(a):
    return a.astype(jnp.bfloat16).astype(jnp.float32)


def reference_forward(x, p):
    """Pure-JAX reference with the same bf16 rounding of the MXU operands."""
    h = jnp.maximum(_bf16_round(x) @ _bf16_round(p["w1"]) + p["b1"], 0.0)
    h = jnp.maximum(_bf16_round(h) @ _bf16_round(p["w2"]) + p["b2"], 0.0)
    h = jnp.maximum(_bf16_round(h) @ _bf16_round(p["w3"]) + p["b3"], 0.0)
    return jax.nn.sigmoid(h @ p["w4"] + p["b4"])


if __name__ == "__main__":
    key = jax.random.PRNGKey(0)
    k_x1, k_p1, k_x2, k_p2 = jax.random.split(key, 4)

    # --- Test 1: small ragged batch, small D (single-K fast path) ---
    batch, input_size = 30, 200
    x = jax.random.normal(k_x1, (batch, input_size), dtype=jnp.float32)
    params = init_params(k_p1, input_size)

    out = jax.block_until_ready(gene_expression_nn(x, params))
    ref = reference_forward(x, params)
    assert out.shape == (batch, 1)
    assert jnp.allclose(out, ref, atol=2e-3, rtol=2e-3), \
        float(jnp.max(jnp.abs(out - ref)))

    # --- Test 2: exercises the multi-batch-tile + K-tiled accumulator path ---
    batch2, input_size2 = 272, 300
    x2 = jax.random.normal(k_x2, (batch2, input_size2), dtype=jnp.float32)
    params2 = init_params(k_p2, input_size2)

    out2 = jax.block_until_ready(gene_expression_nn(x2, params2, k_tile=128))
    ref2 = reference_forward(x2, params2)
    assert out2.shape == (batch2, 1)
    assert jnp.allclose(out2, ref2, atol=2e-3, rtol=2e-3), \
        float(jnp.max(jnp.abs(out2 - ref2)))

    print("KERNEL_OK")
</pallas_src>

<mosaic_0001>
module attributes {stable_mosaic.version = 11 : i64} {
  func.func @kernel(%arg0: i32, %arg1: i32, %arg2: memref<32x200xf32, #tpu.memory_space<vmem>>, %arg3: memref<200x128xbf16, #tpu.memory_space<vmem>>, %arg4: memref<1x128xf32, #tpu.memory_space<vmem>>, %arg5: memref<128x64xbf16, #tpu.memory_space<vmem>>, %arg6: memref<1x64xf32, #tpu.memory_space<vmem>>, %arg7: memref<64x32xbf16, #tpu.memory_space<vmem>>, %arg8: memref<1x32xf32, #tpu.memory_space<vmem>>, %arg9: memref<1x32xf32, #tpu.memory_space<vmem>>, %arg10: memref<1xf32, #tpu.memory_space<smem>>, %arg11: memref<1x32xf32, #tpu.memory_space<vmem>>) attributes {dimension_semantics = [#tpu.dimension_semantics<parallel>, #tpu.dimension_semantics<arbitrary>], iteration_bounds = array<i64: 1, 1>, scalar_prefetch = 0 : i64, scratch_operands = 0 : i64, tpu.core_type = #tpu.core_type<tc>, window_params = [{transform_indices = @transform_0, window_bounds = array<i64: 32, 200>}, {transform_indices = @transform_1, window_bounds = array<i64: 200, 128>}, {pipeline_mode = #tpu.pipeline_mode<synchronous>, transform_indices = @transform_2, window_bounds = array<i64: 1, 128>}, {pipeline_mode = #tpu.pipeline_mode<synchronous>, transform_indices = @transform_3, window_bounds = array<i64: 128, 64>}, {pipeline_mode = #tpu.pipeline_mode<synchronous>, transform_indices = @transform_4, window_bounds = array<i64: 1, 64>}, {pipeline_mode = #tpu.pipeline_mode<synchronous>, transform_indices = @transform_5, window_bounds = array<i64: 64, 32>}, {pipeline_mode = #tpu.pipeline_mode<synchronous>, transform_indices = @transform_6, window_bounds = array<i64: 1, 32>}, {pipeline_mode = #tpu.pipeline_mode<synchronous>, transform_indices = @transform_7, window_bounds = array<i64: 1, 32>}, {transform_indices = @transform_8, window_bounds = array<i64: 1>}, {transform_indices = @transform_9, window_bounds = array<i64: 1, 32>}]} {
    %c0 = arith.constant 0 : index
    %c0_0 = arith.constant 0 : index
    %0 = vector.load %arg2[%c0, %c0_0] : memref<32x200xf32, #tpu.memory_space<vmem>>, vector<32x200xf32>
    %1 = arith.truncf %0 : vector<32x200xf32> to vector<32x200xbf16>
    %c0_1 = arith.constant 0 : index
    %c0_2 = arith.constant 0 : index
    %2 = vector.load %arg3[%c0_1, %c0_2] : memref<200x128xbf16, #tpu.memory_space<vmem>>, vector<200x128xbf16>
    %cst = arith.constant dense<0.000000e+00> : vector<32x128xf32>
    %3 = tpu.matmul %1, %2, %cst {dimension_numbers = #tpu.dot_dimension_numbers<[1], [0], [0], [1], [0, 0, 1, 1], [], []>} : vector<32x200xbf16>, vector<200x128xbf16>, vector<32x128xf32> -> vector<32x128xf32>
    %c0_3 = arith.constant 0 : index
    %c0_4 = arith.constant 0 : index
    %4 = vector.load %arg4[%c0_3, %c0_4] : memref<1x128xf32, #tpu.memory_space<vmem>>, vector<1x128xf32>
    %5 = vector.broadcast %4 : vector<1x128xf32> to vector<32x128xf32>
    %6 = arith.addf %3, %5 : vector<32x128xf32>
    %cst_5 = arith.constant 0.000000e+00 : f32
    %7 = vector.broadcast %cst_5 : f32 to vector<32x128xf32>
    %8 = arith.maximumf %6, %7 : vector<32x128xf32>
    %9 = arith.truncf %8 : vector<32x128xf32> to vector<32x128xbf16>
    %c0_6 = arith.constant 0 : index
    %c0_7 = arith.constant 0 : index
    %10 = vector.load %arg5[%c0_6, %c0_7] : memref<128x64xbf16, #tpu.memory_space<vmem>>, vector<128x64xbf16>
    %cst_8 = arith.constant dense<0.000000e+00> : vector<32x64xf32>
    %11 = tpu.matmul %9, %10, %cst_8 {dimension_numbers = #tpu.dot_dimension_numbers<[1], [0], [0], [1], [0, 0, 1, 1], [], []>} : vector<32x128xbf16>, vector<128x64xbf16>, vector<32x64xf32> -> vector<32x64xf32>
    %c0_9 = arith.constant 0 : index
    %c0_10 = arith.constant 0 : index
    %12 = vector.load %arg6[%c0_9, %c0_10] : memref<1x64xf32, #tpu.memory_space<vmem>>, vector<1x64xf32>
    %13 = vector.broadcast %12 : vector<1x64xf32> to vector<32x64xf32>
    %14 = arith.addf %11, %13 : vector<32x64xf32>
    %cst_11 = arith.constant 0.000000e+00 : f32
    %15 = vector.broadcast %cst_11 : f32 to vector<32x64xf32>
    %16 = arith.maximumf %14, %15 : vector<32x64xf32>
    %17 = arith.truncf %16 : vector<32x64xf32> to vector<32x64xbf16>
    %c0_12 = arith.constant 0 : index
    %c0_13 = arith.constant 0 : index
    %18 = vector.load %arg7[%c0_12, %c0_13] : memref<64x32xbf16, #tpu.memory_space<vmem>>, vector<64x32xbf16>
    %cst_14 = arith.constant dense<0.000000e+00> : vector<32x32xf32>
    %19 = tpu.matmul %17, %18, %cst_14 {dimension_numbers = #tpu.dot_dimension_numbers<[1], [0], [0], [1], [0, 0, 1, 1], [], []>} : vector<32x64xbf16>, vector<64x32xbf16>, vector<32x32xf32> -> vector<32x32xf32>
    %c0_15 = arith.constant 0 : index
    %c0_16 = arith.constant 0 : index
    %20 = vector.load %arg8[%c0_15, %c0_16] : memref<1x32xf32, #tpu.memory_space<vmem>>, vector<1x32xf32>
    %21 = vector.broadcast %20 : vector<1x32xf32> to vector<32x32xf32>
    %22 = arith.addf %19, %21 : vector<32x32xf32>
    %cst_17 = arith.constant 0.000000e+00 : f32
    %23 = vector.broadcast %cst_17 : f32 to vector<32x32xf32>
    %24 = arith.maximumf %22, %23 : vector<32x32xf32>
    %c0_18 = arith.constant 0 : index
    %c0_19 = arith.constant 0 : index
    %25 = vector.load %arg9[%c0_18, %c0_19] : memref<1x32xf32, #tpu.memory_space<vmem>>, vector<1x32xf32>
    %cst_20 = arith.constant dense<0.000000e+00> : vector<1x32xf32>
    %26 = tpu.matmul %25, %24, %cst_20 {dimension_numbers = #tpu.dot_dimension_numbers<[1], [1], [0], [0], [0, 0, 1, 0], [], []>} : vector<1x32xf32>, vector<32x32xf32>, vector<1x32xf32> -> vector<1x32xf32>
    %c0_21 = arith.constant 0 : index
    %27 = memref.load %arg10[%c0_21] : memref<1xf32, #tpu.memory_space<smem>>
    %28 = vector.broadcast %27 : f32 to vector<1x32xf32>
    %29 = arith.addf %26, %28 : vector<1x32xf32>
    %30 = arith.negf %29 : vector<1x32xf32>
    %31 = math.exp %30 : vector<1x32xf32>
    %cst_22 = arith.constant 1.000000e+00 : f32
    %32 = vector.broadcast %cst_22 : f32 to vector<1x32xf32>
    %33 = arith.addf %32, %31 : vector<1x32xf32>
    %34 = arith.divf %32, %33 : vector<1x32xf32>
    %c0_23 = arith.constant 0 : index
    %c0_24 = arith.constant 0 : index
    %35 = vector.load %arg11[%c0_23, %c0_24] : memref<1x32xf32, #tpu.memory_space<vmem>>, vector<1x32xf32>
    tpu.vector_store %arg11[%c0_23, %c0_24], %34 {strides = array<i32>} : memref<1x32xf32, #tpu.memory_space<vmem>>, vector<1x32xf32>,
    return
  }
  func.func @transform_0(%arg0: i32, %arg1: i32) -> (i32, i32) {
    %c0_i32 = arith.constant 0 : i32
    return %arg0, %arg1 : i32, i32
  }
  func.func @transform_1(%arg0: i32, %arg1: i32) -> (i32, i32) {
    %c0_i32 = arith.constant 0 : i32
    %c0_i32_0 = arith.constant 0 : i32
    return %arg1, %c0_i32 : i32, i32
  }
  func.func @transform_2(%arg0: i32, %arg1: i32) -> (i32, i32) {
    %c0_i32 = arith.constant 0 : i32
    %c0_i32_0 = arith.constant 0 : i32
    %c0_i32_1 = arith.constant 0 : i32
    return %c0_i32, %c0_i32_0 : i32, i32
  }
  func.func @transform_3(%arg0: i32, %arg1: i32) -> (i32, i32) {
    %c0_i32 = arith.constant 0 : i32
    %c0_i32_0 = arith.constant 0 : i32
    %c0_i32_1 = arith.constant 0 : i32
    return %c0_i32, %c0_i32_0 : i32, i32
  }
  func.func @transform_4(%arg0: i32, %arg1: i32) -> (i32, i32) {
    %c0_i32 = arith.constant 0 : i32
    %c0_i32_0 = arith.constant 0 : i32
    %c0_i32_1 = arith.constant 0 : i32
    return %c0_i32, %c0_i32_0 : i32, i32
  }
  func.func @transform_5(%arg0: i32, %arg1: i32) -> (i32, i32) {
    %c0_i32 = arith.constant 0 : i32
    %c0_i32_0 = arith.constant 0 : i32
    %c0_i32_1 = arith.constant 0 : i32
    return %c0_i32, %c0_i32_0 : i32, i32
  }
  func.func @transform_6(%arg0: i32, %arg1: i32) -> (i32, i32) {
    %c0_i32 = arith.constant 0 : i32
    %c0_i32_0 = arith.constant 0 : i32
    %c0_i32_1 = arith.constant 0 : i32
    return %c0_i32, %c0_i32_0 : i32, i32
  }
  func.func @transform_7(%arg0: i32, %arg1: i32) -> (i32, i32) {
    %c0_i32 = arith.constant 0 : i32
    %c0_i32_0 = arith.constant 0 : i32
    %c0_i32_1 = arith.constant 0 : i32
    return %c0_i32, %c0_i32_0 : i32, i32
  }
  func.func @transform_8(%arg0: i32, %arg1: i32) -> i32 {
    %c0_i32 = arith.constant 0 : i32
    %c0_i32_0 = arith.constant 0 : i32
    return %c0_i32 : i32
  }
  func.func @transform_9(%arg0: i32, %arg1: i32) -> (i32, i32) {
    %c0_i32 = arith.constant 0 : i32
    %c0_i32_0 = arith.constant 0 : i32
    return %c0_i32, %arg0 : i32, i32
  }
}

</mosaic_0001>

<bundles_post_ra>
// kernel: tpu_custom_call.1
= control target key start
LH: loop header
LB: loop body
LE: loop exit
PB: predicated region body
PF: predicated region fallthrough
CT: control target
= control target key end

     0   :  { %15 = vsyncpa [#allocation4], 0  ;;  %s940_s0 = inlined_call_operand.hbm [shape: f32[32,200], index: 0, kind: input, shape index: {}]   ;;  %s941_s1 = inlined_call_operand.vmem [shape: bf16[200,128], index: 1, kind: input, shape index: {}]   ;;  %s942_s2 = inlined_call_operand.vmem [shape: f32[1,128], index: 2, kind: input, shape index: {}]   ;;  %s943_s3 = inlined_call_operand.vmem [shape: bf16[128,64], index: 3, kind: input, shape index: {}]   ;;  %s944_s4 = inlined_call_operand.vmem [shape: f32[1,64], index: 4, kind: input, shape index: {}]   ;;  %s945_s5 = inlined_call_operand.vmem [shape: bf16[64,32], index: 5, kind: input, shape index: {}]   ;;  %s946_s6 = inlined_call_operand.vmem [shape: f32[1,32], index: 6, kind: input, shape index: {}]   ;;  %s947_s7 = inlined_call_operand.vmem [shape: f32[1,32], index: 7, kind: input, shape index: {}]   ;;  %s948_s8 = inlined_call_operand.<no memory space> [shape: f32[1], index: 8, kind: input, shape index: {}]   ;;  %s949_s9 = inlined_call_operand.hbm [shape: f32[1,32], index: 9, kind: output, shape index: {}]  }
   0x1   :  { %16 = vsyncpa [#allocation5], 0  ;;  %s766_s30 = smov [#allocation3]   ;;  %s718_s13 = scalar_lea.hbm %s940_s0, 1024 }
   0x2   :  { %s22_s10 = sshll.u32 %s766_s30, 4  ;;  %p719_p0 = scmp.ne.s32.totalorder %s940_s0, %s718_s13  ;;  %s23_s10 = int_to_ptr.vmem [resolvable:$true] %s22_s10 }
   0x3   :  { %p722_p1 = scmp.lt.u32.totalorder %s718_s13, %s940_s0 }
   0x5   :  { %p724_p2 = pnand %p722_p1, %p719_p0 }
   0x7   :  { %727 = shalt.err (!%p724_p2)
}
   0x8   :  { %s728_s18 = scalar_lea.vmem %s23_s10, 1024  ;;  %p733_p4 = scmp.lt.s32.totalorder %s23_s10, %s23_s10 }
   0x9   :  { %p729_p3 = scmp.ne.s32.totalorder %s23_s10, %s728_s18  ;;  %p734_p5 = scmp.lt.s32.totalorder %s728_s18, %s728_s18 }
   0xb   :  { %p735_p6 = por %p734_p5, %p733_p4 }
   0xd   :  { %p736_p7 = pnand %p735_p6, %p729_p3 }
   0xf   :  { %739 = shalt.err (!%p736_p7)
}
  0x10   :  { %s767_s19 = smov 256   ;;  %s768_s20 = smov 16  }
  0x11   :  { %28 = dma.hbm_to_vmem [thread:$0]  %s940_s0, 1024, %s23_s10, [#allocation4], %s767_s19, %s767_s19, %s768_s20  }
  0x12   :  { %762 = dma.done.wait [#allocation4], 1024  }
  0x13   :  { %763 = vsyncadd [#allocation4], 4294966272  ;;  %v769_v0 = vmov 0   ;;  %v689_v1 = vld [vmem:[%s941_s1] sm:$0xff]   ;;  %v690_v2 = vld [vmem:[%s941_s1 + $0x8] sm:$0xff]   ;;  %vm168_vm0 = vcmask 588800  }
  0x14   :  { %179 = vmatprep.subr.bf16.mxu0 %v769_v0  ;;  %v691_v3 = vld [vmem:[%s941_s1 + $0x10] sm:$0xff]   ;;  %v692_v4 = vld [vmem:[%s941_s1 + $0x18] sm:$0xff]   ;;  %v50_v5 = vld [vmem:[#allocation3 + $0x8] sm:$0xff]  ;;  %vm175_vm1 = vcmask 1043456   ;;  %vm399_vm2 = vcmask 523264   ;;  %vm771_vm3 = vmmov 0  }
  0x15   :  { %180 = vmatpush1.bf16.msra.mxu0 %v689_v1  ;;  %v52_v6 = vld [vmem:[#allocation3 + $0x18] sm:$0xff]  ;;  %v693_v7 = vld [vmem:[%s941_s1 + $0x20] sm:$0xff]   ;;  %v703_v10 = vld [vmem:[%s943_s3 + $0x8] sm:$0xff]   ;;  %vm462_vm4 = vcmask 261120   ;;  %s773_s11 = smov [#allocation6]   ;;  %vm554_vm6 = vcmask 253952  }
  0x16   :  { %181 = vmatprep.subr.bf16.mxu0 %v769_v0  ;;  %v58_v8 = vpack.c.bf16 %v52_v6, %v50_v5  ;;  %v702_v9 = vld [vmem:[%s943_s3] sm:$0xff]   ;;  %v694_v11 = vld [vmem:[%s941_s1 + $0x28] sm:$0xff]   ;;  %v704_v12 = vld [vmem:[%s943_s3 + $0x10] sm:$0xff]   ;;  %s562_s12 = sshll.u32 %s773_s11, 4  ;;  %s563_s12 = int_to_ptr.vmem [resolvable:$true] %s562_s12 }
  0x17   :  { %630 = vmatprep.subr.bf16.mxu1 %v702_v9  ;;  %v695_v13 = vld [vmem:[%s941_s1 + $0x30] sm:$0xff]   ;;  %v705_v14 = vld [vmem:[%s943_s3 + $0x18] sm:$0xff]   ;;  %v697_v16 = vld [vmem:[%s941_s1 + $0x40] sm:$0xff]   ;;  %s744_s13 = scalar_lea.vmem %s563_s12, 32  ;;  %p745_p9 = scmp.lt.s32.totalorder %s563_s12, %s563_s12 }
  0x18   :  { %585 = vmatprep.mubr.msk.bf16.mxu0 %vm168_vm0, %v58_v8  ;;  %631 = vmatpush3.bf16.msra.mxu1 %v702_v9  ;;  %v696_v15 = vld [vmem:[%s941_s1 + $0x38] sm:$0xff]   ;;  %v698_v17 = vld [vmem:[%s941_s1 + $0x48] sm:$0xff]   ;;  %v699_v18 = vld [vmem:[%s941_s1 + $0x50] sm:$0xff]   ;;  %v770_v9 = vmov 0.0|0.0  }
  0x19   :  { %182 = vmatpush1.bf16.msra.mxu0 %v690_v2  ;;  %632 = vmatprep.subr.bf16.mxu1 %v703_v10  ;;  %v700_v19 = vld [vmem:[%s941_s1 + $0x58] sm:$0xff]   ;;  %v701_v20 = vld [vmem:[%s941_s1 + $0x60] ss:$0 sps:$4 sm:$0xff]   ;;  %v51_v22 = vld [vmem:[#allocation3 + $0x10] sm:$0xff] }
  0x1a   :  { %183 = vmatprep.subr.bf16.mxu0 %v769_v0  ;;  %v49_v21 = vld [vmem:[#allocation3] sm:$0xff]  ;;  %v177_v23 = vsel %vm175_vm1, %v701_v20, 0  ;;  %v54_v24 = vld [vmem:[#allocation3 + $0x28] sm:$0xff]  ;;  %v56_v25 = vld [vmem:[#allocation3 + $0x38] sm:$0xff] }
  0x1b   :  { %v57_v26 = vpack.c.bf16 %v51_v22, %v49_v21  ;;  %v60_v27 = vpack.c.bf16 %v56_v25, %v54_v24  ;;  %v53_v28 = vld [vmem:[#allocation3 + $0x20] sm:$0xff]  ;;  %v55_v29 = vld [vmem:[#allocation3 + $0x30] sm:$0xff]  ;;  %v707_v32 = vld [vmem:[%s943_s3 + $0x28] sm:$0xff]  }
  0x1c   :  { %633 = vmatpush3.bf16.msra.mxu1 %v703_v10  ;;  %v59_v30 = vpack.c.bf16 %v55_v29, %v53_v28  ;;  %v706_v31 = vld [vmem:[%s943_s3 + $0x20] sm:$0xff]   ;;  %v708_v33 = vld [vmem:[%s943_s3 + $0x30] sm:$0xff]   ;;  %v709_v34 = vld [vmem:[%s943_s3 + $0x38] sm:$0xff]   ;;  %v772_v10 = vmov 0.0  }
  0x1d   :  { %184 = vmatpush1.bf16.msra.mxu0 %v691_v3  ;;  %634 = vmatprep.subr.bf16.mxu1 %v704_v12  ;;  %v710_v35 = vld [vmem:[%s945_s5] sm:$0xff]   ;;  %v711_v55 = vld [vmem:[%s945_s5 + $0x8] sm:$0xff]   ;;  %v712_v56 = vld [vmem:[%s945_s5 + $0x10] sm:$0xff]  }
  0x1e   :  { %185 = vmatprep.subr.bf16.mxu0 %v769_v0  ;;  %v571_v36 = vld [vmem:[%s942_s2] ss:$0 sm:$0xff]  ;;  %v713_v57 = vld [vmem:[%s945_s5 + $0x18] sm:$0xff]   ;;  %vm675_vm5 = vmpackc.low %vm462_vm4, %vm462_vm4 }
  0x1f   :  { %v587_v58 = vld [vmem:[%s944_s4] ss:$0 sm:$0xff] }
  0x20   :  { %635 = vmatpush3.bf16.msra.mxu1 %v704_v12 }
  0x21   :  { %186 = vmatpush1.bf16.msra.mxu0 %v692_v4  ;;  %636 = vmatprep.subr.bf16.mxu1 %v705_v14 }
  0x22   :  { %187 = vmatprep.subr.bf16.mxu0 %v769_v0 }
  0x24   :  { %637 = vmatpush3.bf16.msra.mxu1 %v705_v14 }
  0x25   :  { %188 = vmatpush1.bf16.msra.mxu0 %v693_v7  ;;  %638 = vmatprep.subr.bf16.mxu1 %v706_v31 }
  0x26   :  { %189 = vmatprep.subr.bf16.mxu0 %v769_v0 }
  0x28   :  { %639 = vmatpush3.bf16.msra.mxu1 %v706_v31 }
  0x29   :  { %190 = vmatpush1.bf16.msra.mxu0 %v694_v11  ;;  %640 = vmatprep.subr.bf16.mxu1 %v707_v32  ;;  %v596_v11 = vld [vmem:[%s946_s6] ss:$0 sm:$0xff] }
  0x2a   :  { %191 = vmatprep.subr.bf16.mxu0 %v769_v0 }
  0x2c   :  { %641 = vmatpush3.bf16.msra.mxu1 %v707_v32 }
  0x2d   :  { %192 = vmatpush1.bf16.msra.mxu0 %v695_v13  ;;  %642 = vmatprep.subr.bf16.mxu1 %v708_v33 }
  0x2e   :  { %193 = vmatprep.subr.bf16.mxu0 %v769_v0 }
  0x30   :  { %643 = vmatpush3.bf16.msra.mxu1 %v708_v33 }
  0x31   :  { %194 = vmatpush1.bf16.msra.mxu0 %v696_v15  ;;  %644 = vmatprep.subr.bf16.mxu1 %v709_v34 }
  0x32   :  { %195 = vmatprep.subr.bf16.mxu0 %v769_v0 }
  0x34   :  { %645 = vmatpush3.bf16.msra.mxu1 %v709_v34 }
  0x35   :  { %196 = vmatpush1.bf16.msra.mxu0 %v697_v16  ;;  %650 = vmatprep.subr.bf16.mxu1 %v710_v35 }
  0x36   :  { %197 = vmatprep.subr.bf16.mxu0 %v769_v0 }
  0x39   :  { %198 = vmatpush1.bf16.msra.mxu0 %v698_v17 }
  0x3a   :  { %199 = vmatprep.subr.bf16.mxu0 %v769_v0 }
  0x3d   :  { %200 = vmatpush1.bf16.msra.mxu0 %v699_v18 }
  0x3e   :  { %201 = vmatprep.subr.bf16.mxu0 %v769_v0 }
  0x41   :  { %202 = vmatpush1.bf16.msra.mxu0 %v700_v19 }
  0x42   :  { %203 = vmatprep.subr.bf16.mxu0 %v769_v0 }
  0x45   :  { %204 = vmatpush1.bf16.msra.mxu0 %v177_v23 }
  0x48   :  { %212 = vmatmul.mubr.bf16.vlgmr.msra.gmra.mrb[0].mxu0 %v57_v26  ;;  %v459_v26 = vld [vmem:[%s947_s7] sm:$0x1]  ;;  %s740_s7 = scalar_lea.vmem %s563_s12, 16 }
  0x49   :  { %586 = vmatprep.mubr.msk.bf16.mxu0 %vm168_vm0, %v60_v27  ;;  %v461_v27 = vstv %s948_s8  ;;  %p741_p8 = scmp.ne.s32.totalorder %s563_s12, %s740_s7  ;;  %p746_p10 = scmp.lt.s32.totalorder %s744_s13, %s740_s7 }
  0x4b   :  { %p747_p11 = por %p746_p10, %p745_p9 }
  0x4d   :  { %p748_p12 = pnand %p747_p11, %p741_p8 }
  0x50   :  { %220 = vmatmul.mubr.bf16.gmra.mrb[4].mxu0 %v59_v30 }
 0x11b   :  { %v213_v37 = vpop.f32.mrb[0].mxu0 }
 0x11c   :  { %v214_v38 = vadd.f32 %v571_v36, %v213_v37  ;;  %v215_v39 = vpop.f32.mrb[1].mxu0 }
 0x11d   :  { %v216_v40 = vpop.f32.mrb[2].mxu0 }
 0x11e   :  { %v217_v41 = vadd.f32 %v571_v36, %v216_v40  ;;  %v218_v42 = vpop.f32.mrb[3].mxu0  ;;  %v228_v43 = vmax.f32 %v214_v38, 0.0 }
 0x120   :  { %v229_v44 = vmax.f32 %v217_v41, 0.0 }
 0x122   :  { %v232_v45 = vpack.c.bf16 %v229_v44, %v228_v43 }
 0x123   :  { %v221_v46 = vpop.f32.mrb[4].mxu0 }
 0x124   :  { %v222_v47 = vadd.f32 %v571_v36, %v221_v46  ;;  %v223_v48 = vpop.f32.mrb[5].mxu0  ;;  %646 = vmatprep.mubr.bf16.mxu1 %v232_v45 }
 0x125   :  { %v224_v49 = vpop.f32.mrb[6].mxu0 }
 0x126   :  { %v225_v50 = vadd.f32 %v571_v36, %v224_v49  ;;  %v226_v51 = vpop.f32.mrb[7].mxu0  ;;  %v230_v52 = vmax.f32 %v222_v47, 0.0 }
 0x128   :  { %v231_v53 = vmax.f32 %v225_v50, 0.0 }
 0x12a   :  { %v233_v54 = vpack.c.bf16 %v231_v53, %v230_v52 }
 0x12c   :  { %647 = vmatmul.mubr.bf16.vlgmr.msra.gmra.mrb[0].mxu1 %v233_v54 }
 0x12d   :  { %651 = vmatpush3.bf16.msra.mxu1 %v710_v35 }
 0x12e   :  { %652 = vmatprep.subr.bf16.mxu1 %v711_v55 }
 0x131   :  { %653 = vmatpush3.bf16.msra.mxu1 %v711_v55 }
 0x132   :  { %654 = vmatprep.subr.bf16.mxu1 %v712_v56 }
 0x135   :  { %655 = vmatpush3.bf16.msra.mxu1 %v712_v56 }
 0x136   :  { %656 = vmatprep.subr.bf16.mxu1 %v713_v57 }
 0x139   :  { %657 = vmatpush3.bf16.msra.mxu1 %v713_v57 }
 0x13a   :  { %673 = vmatprep.subr.bf16.mxu1 %v770_v9 }
 0x1ff   :  { %v648_v59 = vpop.f32.mrb[0].mxu1 }
 0x200   :  { %v348_v60 = vadd.f32 %v648_v59, %v587_v58  ;;  %v339_v61 = vpop.f32.mrb[1].mxu1 }
 0x201   :  { %v340_v62 = vadd.f32 %v587_v58, %v339_v61  ;;  %v649_v63 = vpop.f32.mrb[2].mxu1 }
 0x202   :  { %v351_v0 = vadd.f32 %v649_v63, %v587_v58  ;;  %v342_v1 = vpop.f32.mrb[3].mxu1  ;;  %v356_v3 = vmax.f32 %v348_v60, 0.0 }
 0x203   :  { %v343_v2 = vadd.f32 %v587_v58, %v342_v1  ;;  %v354_v5 = vmax.f32 %v340_v62, 0.0 }
 0x204   :  { %v357_v4 = vmax.f32 %v351_v0, 0.0 }
 0x205   :  { %v355_v6 = vmax.f32 %v343_v2, 0.0 }
 0x206   :  { %v359_v7 = vpack.c.bf16 %v357_v4, %v356_v3 }
 0x207   :  { %v358_v8 = vpack.c.bf16 %v355_v6, %v354_v5 }
 0x209   :  { %658 = vmatprep.mubr.msk.bf16.mxu1 %vm399_vm2, %v358_v8 }
 0x20a   :  { %659 = vmatmul.mubr.msk.bf16.vlgmr.msra.gmra.mrb[4].mxu1 %vm399_vm2, %v359_v7 }
 0x20b   :  { %670 = vmatprep.mubr.msk.f32.mxu1 %vm771_vm3, %v772_v10 }
 0x2dd   :  { %v660_v12 = vpop.f32.mrb[4].mxu1 }
 0x2de   :  { %v449_v13 = vadd.f32 %v660_v12, %v596_v11  ;;  %v440_v14 = vpop.f32.mrb[5].mxu1 }
 0x2df   :  { %v441_v15 = vadd.f32 %v596_v11, %v440_v14  ;;  %v661_v16 = vpop.f32.mrb[6].mxu1 }
 0x2e0   :  { %v452_v17 = vadd.f32 %v661_v16, %v596_v11  ;;  %v443_v18 = vpop.f32.mrb[7].mxu1  ;;  %v457_v20 = vmax.f32 %v449_v13, 0.0 }
 0x2e1   :  { %v444_v19 = vadd.f32 %v596_v11, %v443_v18  ;;  %v455_v22 = vmax.f32 %v441_v15, 0.0 }
 0x2e2   :  { %v458_v21 = vmax.f32 %v452_v17, 0.0 }
 0x2e3   :  { %v456_v23 = vmax.f32 %v444_v19, 0.0 }
 0x2e4   :  { %v678_v24 = vpack.c.bf16 %v458_v21, %v457_v20 }
 0x2e5   :  { %v674_v25 = vpack.c.bf16 %v456_v23, %v455_v22 }
 0x2e7   :  { %676 = vmatpush3.bf16.xpose.msk.msra.mxu1 %vm675_vm5, %v674_v25 }
 0x2e8   :  { %677 = vmatprep.subr.bf16.mxu1 %v770_v9 }
 0x2ef   :  { %680 = vmatpush3.bf16.xpose.msk.msra.mxu1 %vm675_vm5, %v678_v24 }
 0x2f6   :  { %671 = vmatmul.mubr.msk.f32.vlgmr.msra.gmra.mrb[8].mxu1 %vm462_vm4, %v459_v26 }
 0x3c9   :  { %v544_v28 = vpop.f32.mrb[8].mxu1 }
 0x3ca   :  { %v545_v29 = vadd.f32 %v544_v28, %v461_v27  ;;  %v672_v30 = vpop.f32.mrb[9].mxu1 }
 0x3cc   :  { %v608_v31 = vmul.f32 -1.442695, %v545_v29 }
 0x3ce   :  { %714 = vpow2.f32 %v608_v31 }
 0x3d8   :  { %v715_v32 = vpop.eup %714 }
 0x3d9   :  { %v551_v33 = vadd.f32 1.0, %v715_v32 }
 0x3db   :  { %716 = vrcp.f32 %v551_v33 }
 0x3e5   :  { %v717_v34 = vpop.eup %716 }
 0x3e6   :  { %555 = vst.msk [vmem:[#allocation6] sm:$0x1] %vm554_vm6, %v717_v34 }
 0x3e7   :  { %751 = shalt.err (!%p748_p12)
}
 0x3e8   :  { %s752_s14 = scalar_lea.hbm %s949_s9, 16 }
 0x3e9   :  { %p753_p13 = scmp.ne.s32.totalorder %s949_s9, %s752_s14  ;;  %p756_p0 = scmp.lt.u32.totalorder %s752_s14, %s949_s9 }
 0x3eb   :  { %p758_p1 = pnand %p756_p0, %p753_p13 }
 0x3ed   :  { %761 = shalt.err (!%p758_p1)
}
 0x3ee   :  { %565 = dma.vmem_to_hbm [thread:$0]  %s563_s12, 16, %s949_s9, [#allocation5]  }
 0x3ef   :  { %764 = dma.done.wait [#allocation5], 16  }
 0x3f0   :  { %765 = vsyncadd [#allocation5], 4294967280 }
 0x3f1   :  { %569 = vsyncpa [#allocation4], 1 }
 0x3f2   :  { %570 = vsyncpa [#allocation5], 1 }

</bundles_post_ra>
